<compile_context>
chip_gen: v7x
topology: tpu7x:2x2x1
jax: 0.10.0
libtpu: 0.0.40
codegen_flags: <defaults>
</compile_context>

<pallas_src>
import functools

import jax
import jax.numpy as jnp
from jax.experimental import pallas as pl
from jax.experimental.pallas import tpu as pltpu
import numpy as np

NEG_SLOPE = 0.01  # default negative_slope of F.leaky_relu


def _leaky_relu(x):
    return jnp.where(x > 0, x, NEG_SLOPE * x)


def _round_up(x, m):
    return ((x + m - 1) // m) * m


def _cdiv(a, b):
    return (a + b - 1) // b


def critic_kernel(sa_ref,
                  w1_ref, b1_ref,
                  w2h_ref, w2a_ref, b2_ref,
                  w3_ref, b3_ref,
                  out_ref, *, state_size):
    # One fused activation tile: (tm, state_size + action_size) f32.
    sa = sa_ref[...]
    state_bf = sa[:, :state_size].astype(jnp.bfloat16)
    action_bf = sa[:, state_size:].astype(jnp.bfloat16)

    # fc1: bf16 x bf16 -> f32 accumulate, bias + leaky_relu in f32.
    h1 = (jnp.dot(state_bf, w1_ref[...], preferred_element_type=jnp.float32)
          + b1_ref[...])
    h1 = _leaky_relu(h1)

    # fc2 on cat((h1, action), 1), expressed concat-free as two bf16 matmuls.
    h1_bf = h1.astype(jnp.bfloat16)
    h2 = (jnp.dot(h1_bf, w2h_ref[...], preferred_element_type=jnp.float32)
          + jnp.dot(action_bf, w2a_ref[...], preferred_element_type=jnp.float32)
          + b2_ref[...])
    h2 = _leaky_relu(h2)
    # NOTE: keeping the elementwise chain in f32 is required on v5e (no bf16
    # VPU); on v6e/v7x a bf16 leaky_relu would shave a few more VALU cycles.

    # fc3 (f2 -> 1): N=1 dot on the MXU (it has slack post-bf16), f32 accum.
    out_ref[...] = (jnp.dot(h2.astype(jnp.bfloat16), w3_ref[...],
                            preferred_element_type=jnp.float32)
                    + b3_ref[...])


def critic_forward(state, action, params, *, block_batch=512):
    """state: (B, state_size) f32, action: (B, action_size) f32 -> (B, 1) f32."""
    w1, b1, w2h, w2a, b2, w3, b3 = params
    B, state_size = state.shape
    action_size = action.shape[1]
    f1 = w1.shape[1]
    f2 = w2h.shape[1]
    assert block_batch % 8 == 0, "batch tile must be a multiple of the sublane (8)"

    # Batch tile: at least 8 rows (f32 sublane), at most block_batch.
    tm = min(block_batch, _round_up(B, 8))
    Bp = _round_up(B, tm)
    # Keep both v7x TensorCores busy: if the whole (padded) batch fits in a
    # single tile but is bigger than one sublane group, split it in two.  On
    # single-TC v5e/v6e this costs at most one extra ~0.35us grid step.
    if Bp // tm < 2 and Bp > 8:
        tm = _round_up(_cdiv(Bp, 2), 8)
        Bp = _round_up(B, tm)

    # Single fused activation operand: one DMA per grid step, lane-packed.
    sa = jnp.concatenate([state, action], axis=1)
    if Bp != B:
        sa = jnp.pad(sa, ((0, Bp - B), (0, 0)))

    grid = (Bp // tm,)

    def resident(arr):
        # Same block for every grid step -> weight/bias stays VMEM-resident.
        return pl.BlockSpec(arr.shape, lambda i, _nd=arr.ndim: (0,) * _nd)

    flops = 2 * Bp * (state_size * f1 + (f1 + action_size) * f2 + f2)
    bytes_accessed = sum(int(a.size) * a.dtype.itemsize
                         for a in (w1, b1, w2h, w2a, b2, w3, b3))
    bytes_accessed += Bp * (state_size + action_size + 1) * 4

    kernel = functools.partial(critic_kernel, state_size=state_size)

    out = pl.pallas_call(
        kernel,
        out_shape=jax.ShapeDtypeStruct((Bp, 1), jnp.float32),
        grid_spec=pltpu.PrefetchScalarGridSpec(
            num_scalar_prefetch=0,
            grid=grid,
            in_specs=[
                pl.BlockSpec((tm, state_size + action_size), lambda i: (i, 0)),
                resident(w1), resident(b1),
                resident(w2h), resident(w2a), resident(b2),
                resident(w3), resident(b3),
            ],
            out_specs=pl.BlockSpec((tm, 1), lambda i: (i, 0)),
        ),
        compiler_params=pltpu.CompilerParams(
            dimension_semantics=("parallel",)),
        cost_estimate=pl.CostEstimate(
            flops=int(flops),
            transcendentals=0,
            bytes_accessed=int(bytes_accessed)),
    )(sa, w1, b1, w2h, w2a, b2, w3, b3)

    return out[:B]


def init_critic_params(key, state_size, action_size, fc_units=(512, 256)):
    """Deterministic synthetic init mirroring the module's reset_parameters.

    Weights stored (in, out) in bf16 (fed natively to the MXU); biases in f32.
    fc2's weight is pre-split along its input dim into the part multiplying h1
    (fc_units[0] rows) and the part multiplying the action (action_size rows).
    fc3's weight is stored as a (fc_units[1], 1) column for the N=1 MXU dot.
    """
    f1, f2 = fc_units
    k = jax.random.split(key, 6)

    # hidden_init uses weight.size()[0] == out_features as fan_in.
    lim1 = 1.0 / np.sqrt(f1)
    lim2 = 1.0 / np.sqrt(f2)
    lim3 = 3e-3

    u = lambda kk, shp, lim: jax.random.uniform(kk, shp, jnp.float32, -lim, lim)

    w1 = u(k[0], (state_size, f1), lim1).astype(jnp.bfloat16)
    b1 = u(k[1], (1, f1), 1.0 / np.sqrt(state_size))      # torch Linear bias default
    w2 = u(k[2], (f1 + action_size, f2), lim2).astype(jnp.bfloat16)
    w2h, w2a = w2[:f1], w2[f1:]
    b2 = u(k[3], (1, f2), 1.0 / np.sqrt(f1 + action_size))
    w3 = u(k[4], (f2, 1), lim3).astype(jnp.bfloat16)       # fc3 weight as a column
    b3 = u(k[5], (1, 1), 1.0 / np.sqrt(f2))
    return (w1, b1, w2h, w2a, b2, w3, b3)


def critic_reference(state, action, params):
    """Pure-JAX reference using the identical bf16-operand / f32-accum math."""
    w1, b1, w2h, w2a, b2, w3, b3 = params
    s_bf = state.astype(jnp.bfloat16)
    a_bf = action.astype(jnp.bfloat16)
    h1 = _leaky_relu(
        jnp.dot(s_bf, w1, preferred_element_type=jnp.float32) + b1)
    h2 = _leaky_relu(
        jnp.dot(h1.astype(jnp.bfloat16), w2h, preferred_element_type=jnp.float32)
        + jnp.dot(a_bf, w2a, preferred_element_type=jnp.float32)
        + b2)
    return (jnp.dot(h2.astype(jnp.bfloat16), w3,
                    preferred_element_type=jnp.float32) + b3)


if __name__ == "__main__":
    key = jax.random.PRNGKey(0)
    k_state, k_action, k_param = jax.random.split(key, 3)

    batch, state_size, action_size = 2, 32, 8
    fc_units = (512, 256)

    state = jax.random.normal(k_state, (batch, state_size), jnp.float32)
    action = jax.random.normal(k_action, (batch, action_size), jnp.float32)
    params = init_critic_params(k_param, state_size, action_size, fc_units)

    out = jax.block_until_ready(critic_forward(state, action, params))
    ref = critic_reference(state, action, params)
    assert out.shape == (batch, 1), out.shape
    np.testing.assert_allclose(np.asarray(out), np.asarray(ref),
                               rtol=1e-2, atol=1e-2)

    # Second check exercising the batch grid: multi-tile + padded ragged tail
    # + the ">= 2 tiles" split path.
    k2s, k2a = jax.random.split(jax.random.PRNGKey(1))
    B2 = 40
    state2 = jax.random.normal(k2s, (B2, state_size), jnp.float32)
    action2 = jax.random.normal(k2a, (B2, action_size), jnp.float32)
    out2 = jax.block_until_ready(
        critic_forward(state2, action2, params, block_batch=16))
    ref2 = critic_reference(state2, action2, params)
    assert out2.shape == (B2, 1), out2.shape
    np.testing.assert_allclose(np.asarray(out2), np.asarray(ref2),
                               rtol=1e-2, atol=1e-2)

    print("KERNEL_OK")
</pallas_src>

<mosaic_0001>
module attributes {stable_mosaic.version = 11 : i64} {
  func.func @critic_kernel(%arg0: i32, %arg1: memref<8x40xf32, #tpu.memory_space<vmem>>, %arg2: memref<32x512xbf16, #tpu.memory_space<vmem>>, %arg3: memref<1x512xf32, #tpu.memory_space<vmem>>, %arg4: memref<512x256xbf16, #tpu.memory_space<vmem>>, %arg5: memref<8x256xbf16, #tpu.memory_space<vmem>>, %arg6: memref<1x256xf32, #tpu.memory_space<vmem>>, %arg7: memref<256x1xbf16, #tpu.memory_space<vmem>>, %arg8: memref<1x1xf32, #tpu.memory_space<vmem>>, %arg9: memref<8x1xf32, #tpu.memory_space<vmem>>) attributes {dimension_semantics = [#tpu.dimension_semantics<parallel>], iteration_bounds = array<i64: 1>, scalar_prefetch = 0 : i64, scratch_operands = 0 : i64, tpu.core_type = #tpu.core_type<tc>, window_params = [{transform_indices = @transform_0, window_bounds = array<i64: 8, 40>}, {pipeline_mode = #tpu.pipeline_mode<synchronous>, transform_indices = @transform_1, window_bounds = array<i64: 32, 512>}, {pipeline_mode = #tpu.pipeline_mode<synchronous>, transform_indices = @transform_2, window_bounds = array<i64: 1, 512>}, {pipeline_mode = #tpu.pipeline_mode<synchronous>, transform_indices = @transform_3, window_bounds = array<i64: 512, 256>}, {pipeline_mode = #tpu.pipeline_mode<synchronous>, transform_indices = @transform_4, window_bounds = array<i64: 8, 256>}, {pipeline_mode = #tpu.pipeline_mode<synchronous>, transform_indices = @transform_5, window_bounds = array<i64: 1, 256>}, {pipeline_mode = #tpu.pipeline_mode<synchronous>, transform_indices = @transform_6, window_bounds = array<i64: 256, 1>}, {pipeline_mode = #tpu.pipeline_mode<synchronous>, transform_indices = @transform_7, window_bounds = array<i64: 1, 1>}, {transform_indices = @transform_8, window_bounds = array<i64: 8, 1>}]} {
    %c0 = arith.constant 0 : index
    %c0_0 = arith.constant 0 : index
    %0 = vector.load %arg1[%c0, %c0_0] : memref<8x40xf32, #tpu.memory_space<vmem>>, vector<8x40xf32>
    %1 = vector.extract_strided_slice %0 {offsets = [0, 0], sizes = [8, 32], strides = [1, 1]} : vector<8x40xf32> to vector<8x32xf32>
    %2 = arith.truncf %1 : vector<8x32xf32> to vector<8x32xbf16>
    %3 = vector.extract_strided_slice %0 {offsets = [0, 32], sizes = [8, 8], strides = [1, 1]} : vector<8x40xf32> to vector<8x8xf32>
    %4 = arith.truncf %3 : vector<8x8xf32> to vector<8x8xbf16>
    %c0_1 = arith.constant 0 : index
    %c0_2 = arith.constant 0 : index
    %5 = vector.load %arg2[%c0_1, %c0_2] : memref<32x512xbf16, #tpu.memory_space<vmem>>, vector<32x512xbf16>
    %cst = arith.constant dense<0.000000e+00> : vector<8x512xf32>
    %6 = tpu.matmul %2, %5, %cst {dimension_numbers = #tpu.dot_dimension_numbers<[1], [0], [0], [1], [0, 0, 1, 1], [], []>} : vector<8x32xbf16>, vector<32x512xbf16>, vector<8x512xf32> -> vector<8x512xf32>
    %c0_3 = arith.constant 0 : index
    %c0_4 = arith.constant 0 : index
    %7 = vector.load %arg3[%c0_3, %c0_4] : memref<1x512xf32, #tpu.memory_space<vmem>>, vector<1x512xf32>
    %8 = vector.broadcast %7 : vector<1x512xf32> to vector<8x512xf32>
    %9 = arith.addf %6, %8 : vector<8x512xf32>
    %cst_5 = arith.constant 0.000000e+00 : f32
    %10 = vector.broadcast %cst_5 : f32 to vector<8x512xf32>
    %11 = arith.cmpf ogt, %9, %10 : vector<8x512xf32>
    %cst_6 = arith.constant 0.00999999977 : f32
    %12 = vector.broadcast %cst_6 : f32 to vector<8x512xf32>
    %13 = arith.mulf %12, %9 : vector<8x512xf32>
    %14 = arith.select %11, %9, %13 : vector<8x512xi1>, vector<8x512xf32>
    %15 = arith.truncf %14 : vector<8x512xf32> to vector<8x512xbf16>
    %c0_7 = arith.constant 0 : index
    %c0_8 = arith.constant 0 : index
    %16 = vector.load %arg4[%c0_7, %c0_8] : memref<512x256xbf16, #tpu.memory_space<vmem>>, vector<512x256xbf16>
    %cst_9 = arith.constant dense<0.000000e+00> : vector<8x256xf32>
    %17 = tpu.matmul %15, %16, %cst_9 {dimension_numbers = #tpu.dot_dimension_numbers<[1], [0], [0], [1], [0, 0, 1, 1], [], []>} : vector<8x512xbf16>, vector<512x256xbf16>, vector<8x256xf32> -> vector<8x256xf32>
    %c0_10 = arith.constant 0 : index
    %c0_11 = arith.constant 0 : index
    %18 = vector.load %arg5[%c0_10, %c0_11] : memref<8x256xbf16, #tpu.memory_space<vmem>>, vector<8x256xbf16>
    %cst_12 = arith.constant dense<0.000000e+00> : vector<8x256xf32>
    %19 = tpu.matmul %4, %18, %cst_12 {dimension_numbers = #tpu.dot_dimension_numbers<[1], [0], [0], [1], [0, 0, 1, 1], [], []>} : vector<8x8xbf16>, vector<8x256xbf16>, vector<8x256xf32> -> vector<8x256xf32>
    %20 = arith.addf %17, %19 : vector<8x256xf32>
    %c0_13 = arith.constant 0 : index
    %c0_14 = arith.constant 0 : index
    %21 = vector.load %arg6[%c0_13, %c0_14] : memref<1x256xf32, #tpu.memory_space<vmem>>, vector<1x256xf32>
    %22 = vector.broadcast %21 : vector<1x256xf32> to vector<8x256xf32>
    %23 = arith.addf %20, %22 : vector<8x256xf32>
    %cst_15 = arith.constant 0.000000e+00 : f32
    %24 = vector.broadcast %cst_15 : f32 to vector<8x256xf32>
    %25 = arith.cmpf ogt, %23, %24 : vector<8x256xf32>
    %cst_16 = arith.constant 0.00999999977 : f32
    %26 = vector.broadcast %cst_16 : f32 to vector<8x256xf32>
    %27 = arith.mulf %26, %23 : vector<8x256xf32>
    %28 = arith.select %25, %23, %27 : vector<8x256xi1>, vector<8x256xf32>
    %29 = arith.truncf %28 : vector<8x256xf32> to vector<8x256xbf16>
    %c0_17 = arith.constant 0 : index
    %c0_18 = arith.constant 0 : index
    %30 = vector.load %arg7[%c0_17, %c0_18] : memref<256x1xbf16, #tpu.memory_space<vmem>>, vector<256x1xbf16>
    %cst_19 = arith.constant dense<0.000000e+00> : vector<8x1xf32>
    %31 = tpu.matmul %29, %30, %cst_19 {dimension_numbers = #tpu.dot_dimension_numbers<[1], [0], [0], [1], [0, 0, 1, 1], [], []>} : vector<8x256xbf16>, vector<256x1xbf16>, vector<8x1xf32> -> vector<8x1xf32>
    %c0_20 = arith.constant 0 : index
    %c0_21 = arith.constant 0 : index
    %32 = vector.load %arg8[%c0_20, %c0_21] : memref<1x1xf32, #tpu.memory_space<vmem>>, vector<1x1xf32>
    %33 = vector.broadcast %32 : vector<1x1xf32> to vector<8x1xf32>
    %34 = arith.addf %31, %33 : vector<8x1xf32>
    %c0_22 = arith.constant 0 : index
    %c0_23 = arith.constant 0 : index
    %35 = vector.load %arg9[%c0_22, %c0_23] : memref<8x1xf32, #tpu.memory_space<vmem>>, vector<8x1xf32>
    tpu.vector_store %arg9[%c0_22, %c0_23], %34 {strides = array<i32>} : memref<8x1xf32, #tpu.memory_space<vmem>>, vector<8x1xf32>,
    return
  }
  func.func @transform_0(%arg0: i32) -> (i32, i32) {
    %c0_i32 = arith.constant 0 : i32
    %c0_i32_0 = arith.constant 0 : i32
    return %arg0, %c0_i32 : i32, i32
  }
  func.func @transform_1(%arg0: i32) -> (i32, i32) {
    %c0_i32 = arith.constant 0 : i32
    %c0_i32_0 = arith.constant 0 : i32
    %c0_i32_1 = arith.constant 0 : i32
    return %c0_i32, %c0_i32_0 : i32, i32
  }
  func.func @transform_2(%arg0: i32) -> (i32, i32) {
    %c0_i32 = arith.constant 0 : i32
    %c0_i32_0 = arith.constant 0 : i32
    %c0_i32_1 = arith.constant 0 : i32
    return %c0_i32, %c0_i32_0 : i32, i32
  }
  func.func @transform_3(%arg0: i32) -> (i32, i32) {
    %c0_i32 = arith.constant 0 : i32
    %c0_i32_0 = arith.constant 0 : i32
    %c0_i32_1 = arith.constant 0 : i32
    return %c0_i32, %c0_i32_0 : i32, i32
  }
  func.func @transform_4(%arg0: i32) -> (i32, i32) {
    %c0_i32 = arith.constant 0 : i32
    %c0_i32_0 = arith.constant 0 : i32
    %c0_i32_1 = arith.constant 0 : i32
    return %c0_i32, %c0_i32_0 : i32, i32
  }
  func.func @transform_5(%arg0: i32) -> (i32, i32) {
    %c0_i32 = arith.constant 0 : i32
    %c0_i32_0 = arith.constant 0 : i32
    %c0_i32_1 = arith.constant 0 : i32
    return %c0_i32, %c0_i32_0 : i32, i32
  }
  func.func @transform_6(%arg0: i32) -> (i32, i32) {
    %c0_i32 = arith.constant 0 : i32
    %c0_i32_0 = arith.constant 0 : i32
    %c0_i32_1 = arith.constant 0 : i32
    return %c0_i32, %c0_i32_0 : i32, i32
  }
  func.func @transform_7(%arg0: i32) -> (i32, i32) {
    %c0_i32 = arith.constant 0 : i32
    %c0_i32_0 = arith.constant 0 : i32
    %c0_i32_1 = arith.constant 0 : i32
    return %c0_i32, %c0_i32_0 : i32, i32
  }
  func.func @transform_8(%arg0: i32) -> (i32, i32) {
    %c0_i32 = arith.constant 0 : i32
    %c0_i32_0 = arith.constant 0 : i32
    return %arg0, %c0_i32 : i32, i32
  }
}

</mosaic_0001>

<bundles_post_ra>
// kernel: tpu_custom_call.1
= control target key start
LH: loop header
LB: loop body
LE: loop exit
PB: predicated region body
PF: predicated region fallthrough
CT: control target
= control target key end

     0   :  { %s1391_s0 = inlined_call_operand.vmem [shape: f32[8,40], index: 0, kind: input, shape index: {}]   ;;  %s1392_s1 = inlined_call_operand.vmem [shape: bf16[32,512], index: 1, kind: input, shape index: {}]   ;;  %s1393_s2 = inlined_call_operand.vmem [shape: f32[1,512], index: 2, kind: input, shape index: {}]   ;;  %s1394_s3 = inlined_call_operand.hbm [shape: bf16[512,256], index: 3, kind: input, shape index: {}]   ;;  %s1395_s4 = inlined_call_operand.vmem [shape: bf16[8,256], index: 4, kind: input, shape index: {}]   ;;  %s1396_s5 = inlined_call_operand.vmem [shape: f32[1,256], index: 5, kind: input, shape index: {}]   ;;  %s1397_s6 = inlined_call_operand.vmem [shape: bf16[256,1], index: 6, kind: input, shape index: {}]   ;;  %s1398_s7 = inlined_call_operand.<no memory space> [shape: f32[1,1], index: 7, kind: input, shape index: {}]   ;;  %s1399_s8 = inlined_call_operand.vmem [shape: f32[8,1], index: 8, kind: output, shape index: {}]  }
   0x1   :  { %v13_v0 = vstv %s1398_s7 }
   0x2   :  { %14 = vst [vmem:[#allocation2] sm:$0x1] %v13_v0 }
   0x3   :  { %15 = vsyncpa [#allocation4], 0  ;;  %s1223_s29 = smov [#allocation3]   ;;  %s1199_s11 = scalar_lea.hbm %s1394_s3, 8192 }
   0x4   :  { %s27_s30 = sshll.u32 %s1223_s29, 4  ;;  %p1200_p0 = scmp.ne.s32.totalorder %s1394_s3, %s1199_s11  ;;  %s28_s30 = int_to_ptr.vmem [resolvable:$true] %s27_s30 }
   0x5   :  { %p1203_p1 = scmp.lt.u32.totalorder %s1199_s11, %s1394_s3 }
   0x7   :  { %p1205_p2 = pnand %p1203_p1, %p1200_p0 }
   0x9   :  { %1208 = shalt.err (!%p1205_p2)
}
   0xa   :  { %s1209_s7 = scalar_lea.vmem %s28_s30, 8192  ;;  %p1214_p4 = scmp.lt.s32.totalorder %s28_s30, %s28_s30 }
   0xb   :  { %p1210_p3 = scmp.ne.s32.totalorder %s28_s30, %s1209_s7  ;;  %p1215_p5 = scmp.lt.s32.totalorder %s1209_s7, %s1209_s7 }
   0xd   :  { %p1216_p6 = por %p1215_p5, %p1214_p4 }
   0xf   :  { %p1217_p7 = pnand %p1216_p6, %p1210_p3 }
  0x11   :  { %1220 = shalt.err (!%p1217_p7)
}
  0x12   :  { %s1224_s16 = smov 128   ;;  %s1225_s17 = smov 8  }
  0x13   :  { %33 = dma.hbm_to_vmem [thread:$0]  %s1394_s3, 8192, %s28_s30, [#allocation4], %s1224_s16, %s1224_s16, %s1225_s17  }
  0x14   :  { %1221 = dma.done.wait [#allocation4], 8192  }
  0x15   :  { %1222 = vsyncadd [#allocation4], 4294959104  ;;  %v1226_v1 = vmov 0   ;;  %v1073_v2 = vld [vmem:[%s1392_s1 + $0x4] ss:$16 sps:$4 sm:$0xff]   ;;  %s1227_s11 = smov 96  }
  0x16   :  { %154 = vmatprep.mubr.bf16.mxu0 %v1226_v1  ;;  %v1075_v3 = vld [vmem:[%s1392_s1] ss:$16 sps:$4 sm:$0xff]   ;;  %122 = vmatprep.subr.bf16.mxu0 %v1073_v2  ;;  %v1076_v4 = vld [vmem:[%s1392_s1 + $0x24] ss:$16 sps:$4 sm:$0xff]   ;;  %v1081_v8 = vld [vmem:[%s1392_s1 + $0xc] ss:$16 sps:$4 sm:$0xff]  }
  0x17   :  { %v46_v5 = vld [vmem:[%s1391_s0] sm:$0xff]  ;;  %123 = vmatpush1.bf16.msra.mxu0 %v1075_v3  ;;  %v1079_v9 = vld [vmem:[%s1392_s1 + $0x8] ss:$16 sps:$4 sm:$0xff]   ;;  %v1084_v10 = vld [vmem:[%s1392_s1 + $0x2c] ss:$16 sps:$4 sm:$0xff]   ;;  %vm118_vm0 = vcmask 261120  }
  0x18   :  { %v1078_v6 = vld [vmem:[%s1392_s1 + $0x20] ss:$16 sps:$4 sm:$0xff]   ;;  %v47_v7 = vpack.c.bf16 %v46_v5, %v46_v5  ;;  %124 = vmatprep.subr.bf16.mxu0 %v1076_v4  ;;  %v1082_v17 = vld [vmem:[%s1392_s1 + $0x28] ss:$16 sps:$4 sm:$0xff]   ;;  %vm297_vm1 = vcmask 1043456   ;;  %vm293_vm2 = vcmask 64512  }
  0x19   :  { %v1085_v11 = vld [vmem:[#allocation3 + $0x4] ss:$8 sps:$4 sm:$0xff]   ;;  %v1088_v12 = vld [vmem:[#allocation3] ss:$8 sps:$4 sm:$0xff]   ;;  %v1090_v14 = vld [vmem:[#allocation3 + $0x14] ss:$8 sps:$4 sm:$0xff]  }
  0x1a   :  { %286 = vrot.lane.b32.xlu0 %v47_v7, %s1227_s11  ;;  %665 = vmatprep.subr.bf16.mxu1 %v1085_v11  ;;  %v284_v13 = vld [vmem:[%s1395_s4] sm:$0xff]  ;;  %v1092_v15 = vld [vmem:[#allocation3 + $0x10] ss:$8 sps:$4 sm:$0xff]   ;;  %vm944_vm9 = vcmask 7168  }
  0x1b   :  { %125 = vmatpush1.bf16.msra.mxu0 %v1078_v6  ;;  %666 = vmatpush1.bf16.msra.mxu1 %v1088_v12  ;;  %v1093_v16 = vld [vmem:[#allocation3 + $0x24] ss:$8 sps:$4 sm:$0xff]   ;;  %v962_v18 = vcombine.high %v284_v13, %v284_v13  ;;  %v961_v19 = vcombine.low %v284_v13, %v284_v13  ;;  %v1098_v20 = vld [vmem:[#allocation3 + $0x20] ss:$8 sps:$4 sm:$0xff]   ;;  %v1099_v21 = vld [vmem:[#allocation3 + $0x34] ss:$8 sps:$4 sm:$0xff]  }
  0x1c   :  { %163 = vmatprep.subr.bf16.mxu0 %v1081_v8  ;;  %667 = vmatprep.subr.bf16.mxu1 %v1090_v14  ;;  %v1097_v23 = vld [vmem:[#allocation3 + $0x104] ss:$8 sps:$4 sm:$0xff]   ;;  %v1104_v24 = vld [vmem:[#allocation3 + $0x30] ss:$8 sps:$4 sm:$0xff]   ;;  %v1110_v26 = vld [vmem:[#allocation3 + $0x40] ss:$8 sps:$4 sm:$0xff]  }
  0x1d   :  { %v299_v22 = vsel %vm297_vm1, %v961_v19, 0  ;;  %v1105_v25 = vld [vmem:[#allocation3 + $0x44] ss:$8 sps:$4 sm:$0xff]   ;;  %v1111_v27 = vld [vmem:[#allocation3 + $0x54] ss:$8 sps:$4 sm:$0xff]  }
  0x1e   :  { %959 = vmatmul.mubr.msk.bf16.vlgmr.msra.gmra.mrb[0].mxu0 %vm118_vm0, %v47_v7  ;;  %v1116_v28 = vld [vmem:[#allocation3 + $0x50] ss:$8 sps:$4 sm:$0xff]   ;;  %v1117_v29 = vld [vmem:[#allocation3 + $0x64] ss:$8 sps:$4 sm:$0xff]   ;;  %v1122_v30 = vld [vmem:[#allocation3 + $0x60] ss:$8 sps:$4 sm:$0xff]  }
  0x1f   :  { %164 = vmatpush1.bf16.msra.mxu0 %v1079_v9  ;;  %195 = vmatprep.mubr.bf16.mxu0 %v1226_v1  ;;  %v1123_v31 = vld [vmem:[#allocation3 + $0x74] ss:$8 sps:$4 sm:$0xff]   ;;  %v1128_v32 = vld [vmem:[#allocation3 + $0x70] ss:$8 sps:$4 sm:$0xff]   ;;  %v1129_v33 = vld [vmem:[#allocation3 + $0x84] ss:$8 sps:$4 sm:$0xff]  }
  0x20   :  { %165 = vmatprep.subr.bf16.mxu0 %v1084_v10  ;;  %668 = vmatpush1.bf16.msra.mxu1 %v1092_v15  ;;  %v1134_v34 = vld [vmem:[#allocation3 + $0x80] ss:$8 sps:$4 sm:$0xff]   ;;  %v1135_v35 = vld [vmem:[#allocation3 + $0x94] ss:$8 sps:$4 sm:$0xff]   ;;  %v1140_v36 = vld [vmem:[#allocation3 + $0x90] ss:$8 sps:$4 sm:$0xff]  }
  0x21   :  { %669 = vmatprep.subr.bf16.mxu1 %v1093_v16  ;;  %v1141_v37 = vld [vmem:[#allocation3 + $0xa4] ss:$8 sps:$4 sm:$0xff]   ;;  %v1146_v38 = vld [vmem:[#allocation3 + $0xa0] ss:$8 sps:$4 sm:$0xff]   ;;  %v1147_v39 = vld [vmem:[#allocation3 + $0xb4] ss:$8 sps:$4 sm:$0xff]  }
  0x22   :  { %v1152_v40 = vld [vmem:[#allocation3 + $0xb0] ss:$8 sps:$4 sm:$0xff]   ;;  %v1153_v41 = vld [vmem:[#allocation3 + $0xc4] ss:$8 sps:$4 sm:$0xff]   ;;  %v1158_v42 = vld [vmem:[#allocation3 + $0xc0] ss:$8 sps:$4 sm:$0xff]  }
  0x23   :  { %166 = vmatpush1.bf16.msra.mxu0 %v1082_v17  ;;  %v1159_v43 = vld [vmem:[#allocation3 + $0xd4] ss:$8 sps:$4 sm:$0xff]   ;;  %v1164_v44 = vld [vmem:[#allocation3 + $0xd0] ss:$8 sps:$4 sm:$0xff]   ;;  %v1165_v45 = vld [vmem:[#allocation3 + $0xe4] ss:$8 sps:$4 sm:$0xff]   ;;  %v58_v17 = vlaneseq }
  0x24   :  { %963 = vmatprep.subr.msk.bf16.mxu0 %vm297_vm1, %v962_v18  ;;  %670 = vmatpush1.bf16.msra.mxu1 %v1098_v20  ;;  %v1170_v46 = vld [vmem:[#allocation3 + $0xe0] ss:$8 sps:$4 sm:$0xff]   ;;  %v1171_v47 = vld [vmem:[#allocation3 + $0xf4] ss:$8 sps:$4 sm:$0xff]   ;;  %v1176_v48 = vld [vmem:[#allocation3 + $0xf0] ss:$8 sps:$4 sm:$0xff]  }
  0x25   :  { %671 = vmatprep.subr.bf16.mxu1 %v1099_v21  ;;  %v1095_v49 = vld [vmem:[#allocation3 + $0x100] ss:$8 sps:$4 sm:$0xff]   ;;  %v1103_v50 = vld [vmem:[#allocation3 + $0x114] ss:$8 sps:$4 sm:$0xff]   ;;  %v1101_v52 = vld [vmem:[#allocation3 + $0x110] ss:$8 sps:$4 sm:$0xff]  }
  0x26   :  { %960 = vmatmul.mubr.msk.bf16.vlgmr.msra.gmra.mrb[4].mxu0 %vm118_vm0, %v47_v7  ;;  %v1109_v53 = vld [vmem:[#allocation3 + $0x124] ss:$8 sps:$4 sm:$0xff]   ;;  %v1107_v54 = vld [vmem:[#allocation3 + $0x120] ss:$8 sps:$4 sm:$0xff]   ;;  %v1115_v55 = vld [vmem:[#allocation3 + $0x134] ss:$8 sps:$4 sm:$0xff]  }
  0x27   :  { %305 = vmatpush1.bf16.msra.mxu0 %v299_v22  ;;  %336 = vmatprep.mubr.bf16.mxu0 %v1226_v1  ;;  %v1113_v56 = vld [vmem:[#allocation3 + $0x130] ss:$8 sps:$4 sm:$0xff]   ;;  %v1121_v57 = vld [vmem:[#allocation3 + $0x144] ss:$8 sps:$4 sm:$0xff]   ;;  %v1119_v58 = vld [vmem:[#allocation3 + $0x140] ss:$8 sps:$4 sm:$0xff]  }
  0x28   :  { %706 = vmatprep.subr.bf16.mxu0 %v1097_v23  ;;  %672 = vmatpush1.bf16.msra.mxu1 %v1104_v24  ;;  %v1127_v59 = vld [vmem:[#allocation3 + $0x154] ss:$8 sps:$4 sm:$0xff]   ;;  %v1125_v60 = vld [vmem:[#allocation3 + $0x150] ss:$8 sps:$4 sm:$0xff]   ;;  %v1133_v61 = vld [vmem:[#allocation3 + $0x164] ss:$8 sps:$4 sm:$0xff]  }
  0x29   :  { %673 = vmatprep.subr.bf16.mxu1 %v1105_v25  ;;  %v1131_v62 = vld [vmem:[#allocation3 + $0x160] ss:$8 sps:$4 sm:$0xff]   ;;  %v1139_v63 = vld [vmem:[#allocation3 + $0x174] ss:$8 sps:$4 sm:$0xff]   ;;  %v1137_v0 = vld [vmem:[#allocation3 + $0x170] ss:$8 sps:$4 sm:$0xff]  }
  0x2a   :  { %v1145_v1 = vld [vmem:[#allocation3 + $0x184] ss:$8 sps:$4 sm:$0xff]   ;;  %v1143_v2 = vld [vmem:[#allocation3 + $0x180] ss:$8 sps:$4 sm:$0xff]   ;;  %v1151_v3 = vld [vmem:[#allocation3 + $0x194] ss:$8 sps:$4 sm:$0xff]  }
  0x2b   :  { %v1149_v4 = vld [vmem:[#allocation3 + $0x190] ss:$8 sps:$4 sm:$0xff]   ;;  %v1157_v5 = vld [vmem:[#allocation3 + $0x1a4] ss:$8 sps:$4 sm:$0xff]   ;;  %v1155_v6 = vld [vmem:[#allocation3 + $0x1a0] ss:$8 sps:$4 sm:$0xff]  }
  0x2c   :  { %674 = vmatpush1.bf16.msra.mxu1 %v1110_v26  ;;  %v1163_v7 = vld [vmem:[#allocation3 + $0x1b4] ss:$8 sps:$4 sm:$0xff]   ;;  %v1161_v8 = vld [vmem:[#allocation3 + $0x1b0] ss:$8 sps:$4 sm:$0xff]   ;;  %v1169_v9 = vld [vmem:[#allocation3 + $0x1c4] ss:$8 sps:$4 sm:$0xff]  }
  0x2d   :  { %675 = vmatprep.subr.bf16.mxu1 %v1111_v27  ;;  %v1167_v10 = vld [vmem:[#allocation3 + $0x1c0] ss:$8 sps:$4 sm:$0xff]   ;;  %v1175_v11 = vld [vmem:[#allocation3 + $0x1d4] ss:$8 sps:$4 sm:$0xff]   ;;  %v1173_v12 = vld [vmem:[#allocation3 + $0x1d0] ss:$8 sps:$4 sm:$0xff]  }
  0x2e   :  { %v1179_v13 = vld [vmem:[#allocation3 + $0x1e4] ss:$8 sps:$4 sm:$0xff]   ;;  %v1177_v14 = vld [vmem:[#allocation3 + $0x1e0] ss:$8 sps:$4 sm:$0xff]   ;;  %v1182_v15 = vld [vmem:[#allocation3 + $0x1f4] ss:$8 sps:$4 sm:$0xff]  }
  0x2f   :  { %v1180_v16 = vld [vmem:[#allocation3 + $0x1f0] ss:$8 sps:$4 sm:$0xff]   ;;  %v1183_v18 = vld [vmem:[%s1397_s6 + $0x40] sm:$0xff]   ;;  %v1323_v19 = vshrl.u32 %v58_v17, 7 }
  0x30   :  { %676 = vmatpush1.bf16.msra.mxu1 %v1116_v28  ;;  %v56_v21 = vld [vmem:[%s1393_s2] sm:$0xf] }
  0x31   :  { %677 = vmatprep.subr.bf16.mxu1 %v1117_v29  ;;  %v60_v20 = vsub.s32 0, %v1323_v19  ;;  %v64_v22 = vsub.s32 1, %v1323_v19  ;;  %v68_v28 = vsub.s32 2, %v1323_v19 }
  0x33   :  { %v61_v23 = vrot.slane %v56_v21, %v60_v20  ;;  %v65_v24 = vrot.slane %v56_v21, %v64_v22 }
  0x34   :  { %678 = vmatpush1.bf16.msra.mxu1 %v1122_v30 }
  0x35   :  { %679 = vmatprep.subr.bf16.mxu1 %v1123_v31  ;;  %v72_v31 = vsub.s32 3, %v1323_v19  ;;  %v1029_v19 = vld [vmem:[#allocation2] ss:$0 sm:$0xff] }
  0x38   :  { %680 = vmatpush1.bf16.msra.mxu1 %v1128_v32 }
  0x39   :  { %681 = vmatprep.subr.bf16.mxu1 %v1129_v33 }
  0x3c   :  { %682 = vmatpush1.bf16.msra.mxu1 %v1134_v34 }
  0x3d   :  { %683 = vmatprep.subr.bf16.mxu1 %v1135_v35  ;;  %v69_v35 = vrot.slane %v56_v21, %v68_v28 }
  0x40   :  { %684 = vmatpush1.bf16.msra.mxu1 %v1140_v36 }
  0x41   :  { %685 = vmatprep.subr.bf16.mxu1 %v1141_v37  ;;  %v73_v37 = vrot.slane %v56_v21, %v72_v31 }
  0x44   :  { %686 = vmatpush1.bf16.msra.mxu1 %v1146_v38 }
  0x45   :  { %687 = vmatprep.subr.bf16.mxu1 %v1147_v39 }
  0x48   :  { %688 = vmatpush1.bf16.msra.mxu1 %v1152_v40  ;;  %v1184_v40 = vld [vmem:[%s1397_s6] sm:$0xff]  }
  0x49   :  { %689 = vmatprep.subr.bf16.mxu1 %v1153_v41 }
  0x4c   :  { %690 = vmatpush1.bf16.msra.mxu1 %v1158_v42 }
  0x4d   :  { %691 = vmatprep.subr.bf16.mxu1 %v1159_v43  ;;  %v1185_v43 = vld [vmem:[%s1397_s6 + $0x48] sm:$0xff]  }
  0x50   :  { %692 = vmatpush1.bf16.msra.mxu1 %v1164_v44 }
  0x51   :  { %693 = vmatprep.subr.bf16.mxu1 %v1165_v45 }
  0x54   :  { %694 = vmatpush1.bf16.msra.mxu1 %v1170_v46 }
  0x55   :  { %695 = vmatprep.subr.bf16.mxu1 %v1171_v47 }
  0x58   :  { %696 = vmatpush1.bf16.msra.mxu1 %v1176_v48 }
  0x59   :  { %1046 = vmatprep.subr.bf16.mxu1 %v1183_v18 }
  0x8c   :  { %v287_v51 = vpop.permute.xlu0 %286 }
  0x8d   :  { %964 = vmatmul.mubr.msk.bf16.vlgmr.msra.gmra.mrb[8].mxu0 %vm293_vm2, %v287_v51 }
  0x8e   :  { %707 = vmatpush1.bf16.msra.mxu0 %v1095_v49 }
  0x8f   :  { %708 = vmatprep.subr.bf16.mxu0 %v1103_v50  ;;  %v1186_v50 = vld [vmem:[%s1397_s6 + $0x8] sm:$0xff]  }
  0x92   :  { %709 = vmatpush1.bf16.msra.mxu0 %v1101_v52  ;;  %v1187_v52 = vld [vmem:[%s1397_s6 + $0x50] sm:$0xff]  }
  0x93   :  { %710 = vmatprep.subr.bf16.mxu0 %v1109_v53 }
  0x96   :  { %711 = vmatpush1.bf16.msra.mxu0 %v1107_v54 }
  0x97   :  { %712 = vmatprep.subr.bf16.mxu0 %v1115_v55 }
  0x9a   :  { %713 = vmatpush1.bf16.msra.mxu0 %v1113_v56  ;;  %v1188_v56 = vld [vmem:[%s1397_s6 + $0x10] sm:$0xff]  }
  0x9b   :  { %714 = vmatprep.subr.bf16.mxu0 %v1121_v57 }
  0x9e   :  { %715 = vmatpush1.bf16.msra.mxu0 %v1119_v58  ;;  %v1189_v58 = vld [vmem:[%s1397_s6 + $0x58] sm:$0xff]  }
  0x9f   :  { %716 = vmatprep.subr.bf16.mxu0 %v1127_v59  ;;  %v1190_v59 = vld [vmem:[%s1397_s6 + $0x18] sm:$0xff]  }
  0xa2   :  { %717 = vmatpush1.bf16.msra.mxu0 %v1125_v60  ;;  %v1191_v60 = vld [vmem:[%s1397_s6 + $0x60] sm:$0xff]  }
  0xa3   :  { %718 = vmatprep.subr.bf16.mxu0 %v1133_v61  ;;  %v1192_v61 = vld [vmem:[%s1397_s6 + $0x20] sm:$0xff]  }
  0xa6   :  { %719 = vmatpush1.bf16.msra.mxu0 %v1131_v62  ;;  %v1193_v62 = vld [vmem:[%s1397_s6 + $0x68] sm:$0xff]  }
  0xa7   :  { %720 = vmatprep.subr.bf16.mxu0 %v1139_v63  ;;  %v1194_v63 = vld [vmem:[%s1397_s6 + $0x28] sm:$0xff]  }
  0xaa   :  { %721 = vmatpush1.bf16.msra.mxu0 %v1137_v0  ;;  %v1195_v0 = vld [vmem:[%s1397_s6 + $0x70] sm:$0xff]  }
  0xab   :  { %722 = vmatprep.subr.bf16.mxu0 %v1145_v1  ;;  %v1196_v1 = vld [vmem:[%s1397_s6 + $0x30] sm:$0xff]  }
  0xae   :  { %723 = vmatpush1.bf16.msra.mxu0 %v1143_v2  ;;  %v1197_v2 = vld [vmem:[%s1397_s6 + $0x78] sm:$0xff]  }
  0xaf   :  { %724 = vmatprep.subr.bf16.mxu0 %v1151_v3  ;;  %v1198_v3 = vld [vmem:[%s1397_s6 + $0x38] sm:$0xff]  }
  0xb2   :  { %725 = vmatpush1.bf16.msra.mxu0 %v1149_v4 }
  0xb3   :  { %726 = vmatprep.subr.bf16.mxu0 %v1157_v5 }
  0xb6   :  { %727 = vmatpush1.bf16.msra.mxu0 %v1155_v6 }
  0xb7   :  { %728 = vmatprep.subr.bf16.mxu0 %v1163_v7 }
  0xba   :  { %729 = vmatpush1.bf16.msra.mxu0 %v1161_v8 }
  0xbb   :  { %730 = vmatprep.subr.bf16.mxu0 %v1169_v9 }
  0xbe   :  { %731 = vmatpush1.bf16.msra.mxu0 %v1167_v10 }
  0xbf   :  { %732 = vmatprep.subr.bf16.mxu0 %v1175_v11 }
  0xc2   :  { %733 = vmatpush1.bf16.msra.mxu0 %v1173_v12 }
  0xc3   :  { %734 = vmatprep.subr.bf16.mxu0 %v1179_v13 }
  0xc6   :  { %735 = vmatpush1.bf16.msra.mxu0 %v1177_v14  ;;  %v747_v14 = vld [vmem:[%s1396_s5] sm:$0x3] }
  0xc7   :  { %736 = vmatprep.subr.bf16.mxu0 %v1182_v15  ;;  %v752_v15 = vrot.slane %v747_v14, %v60_v20  ;;  %v756_v17 = vrot.slane %v747_v14, %v64_v22 }
  0xca   :  { %737 = vmatpush1.bf16.msra.mxu0 %v1180_v16 }
  0xf1   :  { %v156_v25 = vpop.f32.mrb[0].mxu0 }
  0xf2   :  { %v157_v26 = vadd.f32 %v156_v25, %v61_v23  ;;  %v158_v27 = vpop.f32.mrb[1].mxu0 }
  0xf3   :  { %v159_v29 = vadd.f32 %v158_v27, %v65_v24  ;;  %v160_v30 = vpop.f32.mrb[2].mxu0 }
  0xf4   :  { %vm204_vm3 = vcmp.gt.f32.partialorder %v157_v26, 0.0  ;;  %v208_v32 = vmul.f32 0.01, %v157_v26  ;;  %v161_v33 = vpop.f32.mrb[3].mxu0 }
  0xf5   :  { %vm205_vm4 = vcmp.gt.f32.partialorder %v159_v29, 0.0  ;;  %v209_v34 = vmul.f32 0.01, %v159_v29 }
  0xf6   :  { %v212_v36 = vsel %vm204_vm3, %v157_v26, %v208_v32 }
  0xf7   :  { %v213_v38 = vsel %vm205_vm4, %v159_v29, %v209_v34  ;;  %v216_v42 = vpack.c.bf16 %v212_v36, %v212_v36 }
  0xf8   :  { %v217_v39 = vpack.c.bf16 %v213_v38, %v213_v38 }
  0xf9   :  { %v197_v41 = vpop.f32.mrb[4].mxu0 }
  0xfa   :  { %v198_v44 = vadd.f32 %v197_v41, %v69_v35  ;;  %v199_v45 = vpop.f32.mrb[5].mxu0  ;;  %697 = vmatprep.mubr.bf16.mxu1 %v217_v39 }
  0xfb   :  { %v200_v46 = vadd.f32 %v199_v45, %v73_v37  ;;  %v201_v47 = vpop.f32.mrb[6].mxu0  ;;  %698 = vmatmul.mubr.bf16.vlgmr.msra.gmra.mrb[0].mxu1 %v216_v42 }
  0xfc   :  { %vm206_vm5 = vcmp.gt.f32.partialorder %v198_v44, 0.0  ;;  %v210_v48 = vmul.f32 0.01, %v198_v44  ;;  %v202_v49 = vpop.f32.mrb[7].mxu0  ;;  %1047 = vmatpush3.bf16.msra.mxu1 %v1184_v40 }
  0xfd   :  { %vm207_vm6 = vcmp.gt.f32.partialorder %v200_v46, 0.0  ;;  %v211_v51 = vmul.f32 0.01, %v200_v46  ;;  %1048 = vmatprep.subr.bf16.mxu1 %v1185_v43 }
  0xfe   :  { %v214_v53 = vsel %vm206_vm5, %v198_v44, %v210_v48 }
  0xff   :  { %v215_v54 = vsel %vm207_vm6, %v200_v46, %v211_v51  ;;  %v218_v57 = vpack.c.bf16 %v214_v53, %v214_v53 }
 0x100   :  { %v219_v55 = vpack.c.bf16 %v215_v54, %v215_v54  ;;  %1049 = vmatpush3.bf16.msra.mxu1 %v1186_v50 }
 0x101   :  { %1050 = vmatprep.subr.bf16.mxu1 %v1187_v52 }
 0x102   :  { %738 = vmatprep.mubr.bf16.mxu0 %v219_v55 }
 0x103   :  { %739 = vmatmul.mubr.bf16.vlgmr.msra.gmra.mrb[12].mxu0 %v218_v57 }
 0x104   :  { %1051 = vmatpush3.bf16.msra.mxu1 %v1188_v56 }
 0x105   :  { %1052 = vmatprep.subr.bf16.mxu1 %v1189_v58 }
 0x108   :  { %1053 = vmatpush3.bf16.msra.mxu1 %v1190_v59 }
 0x109   :  { %1054 = vmatprep.subr.bf16.mxu1 %v1191_v60 }
 0x10c   :  { %1055 = vmatpush3.bf16.msra.mxu1 %v1192_v61 }
 0x10d   :  { %1056 = vmatprep.subr.bf16.mxu1 %v1193_v62 }
 0x110   :  { %1057 = vmatpush3.bf16.msra.mxu1 %v1194_v63 }
 0x111   :  { %1058 = vmatprep.subr.bf16.mxu1 %v1195_v0 }
 0x114   :  { %1059 = vmatpush3.bf16.msra.mxu1 %v1196_v1 }
 0x115   :  { %1060 = vmatprep.subr.bf16.mxu1 %v1197_v2 }
 0x118   :  { %1061 = vmatpush3.bf16.msra.mxu1 %v1198_v3 }
 0x160   :  { %v338_v4 = vpop.f32.mrb[8].mxu0 }
 0x161   :  { %v340_v5 = vpop.f32.mrb[9].mxu0 }
 0x162   :  { %v342_v6 = vpop.f32.mrb[10].mxu0 }
 0x163   :  { %v343_v7 = vpop.f32.mrb[11].mxu0 }
 0x1ce   :  { %v699_v8 = vpop.f32.mrb[0].mxu1 }
 0x1cf   :  { %v700_v9 = vadd.f32 %v699_v8, %v338_v4  ;;  %v701_v10 = vpop.f32.mrb[1].mxu1 }
 0x1d0   :  { %v702_v11 = vadd.f32 %v701_v10, %v340_v5  ;;  %v703_v12 = vpop.f32.mrb[2].mxu1 }
 0x1d1   :  { %v704_v13 = vpop.f32.mrb[3].mxu1 }
 0x1d6   :  { %v740_v16 = vpop.f32.mrb[12].mxu0 }
 0x1d7   :  { %v741_v18 = vadd.f32 %v740_v16, %v700_v9  ;;  %v742_v21 = vpop.f32.mrb[13].mxu0 }
 0x1d8   :  { %v743_v23 = vadd.f32 %v742_v21, %v702_v11  ;;  %v744_v24 = vpop.f32.mrb[14].mxu0 }
 0x1d9   :  { %v759_v25 = vadd.f32 %v752_v15, %v741_v18  ;;  %v745_v26 = vpop.f32.mrb[15].mxu0 }
 0x1da   :  { %v760_v27 = vadd.f32 %v756_v17, %v743_v23 }
 0x1db   :  { %vm761_vm7 = vcmp.gt.f32.partialorder %v759_v25, 0.0  ;;  %v763_v28 = vmul.f32 0.01, %v759_v25 }
 0x1dc   :  { %v764_v29 = vmul.f32 0.01, %v760_v27  ;;  %vm762_vm8 = vcmp.gt.f32.partialorder %v760_v27, 0.0 }
 0x1dd   :  { %v765_v30 = vsel %vm761_vm7, %v759_v25, %v763_v28 }
 0x1de   :  { %v766_v31 = vsel %vm762_vm8, %v760_v27, %v764_v29  ;;  %v767_v33 = vpack.c.bf16 %v765_v30, %v765_v30 }
 0x1df   :  { %v768_v32 = vpack.c.bf16 %v766_v31, %v766_v31 }
 0x1e1   :  { %936 = vmatprep.mubr.bf16.mxu1 %v768_v32 }
 0x1e2   :  { %937 = vmatmul.mubr.bf16.vlgmr.msra.gmra.mrb[4].mxu1 %v767_v33 }
 0x2b5   :  { %v1062_v20 = vpop.f32.mrb[4].mxu1 }
 0x2b6   :  { %v1063_v22 = vpop.f32.mrb[5].mxu1 }
 0x2b7   :  { %v1064_v34 = vadd.f32 %v1063_v22, %v1062_v20  ;;  %v1065_v35 = vpop.f32.mrb[6].mxu1 }
 0x2b8   :  { %v1066_v36 = vpop.f32.mrb[7].mxu1 }
 0x2b9   :  { %v939_v37 = vadd.f32 %v1064_v34, %v1029_v19 }
 0x2bb   :  { %945 = vst.msk [vmem:[%s1399_s8] sm:$0xff] %vm944_vm9, %v939_v37 }
 0x2bc   :  { %950 = vsyncpa [#allocation4], 1 }

</bundles_post_ra>
